<compile_context>
chip_gen: v7x
topology: tpu7x:2x2x1
jax: 0.10.0
libtpu: 0.0.40
codegen_flags: <defaults>
</compile_context>

<pallas_src>
import jax
import jax.numpy as jnp
from jax.experimental import pallas as pl
from jax.experimental.pallas import tpu as pltpu


def _h_swish_kernel(x_ref, o_ref):
    x = x_ref[...].astype(jnp.float32)
    # h_sigmoid(x) = ReLU6(x + 3) / 6 ; h_swish(x) = x * h_sigmoid(x)
    o_ref[...] = (x * (jnp.clip(x + 3.0, 0.0, 6.0) / 6.0)).astype(o_ref.dtype)


def _h_swish_jnp(x):
    xf = x.astype(jnp.float32)
    return (xf * (jnp.clip(xf + 3.0, 0.0, 6.0) / 6.0)).astype(x.dtype)


def _round_up(v, m):
    return ((v + m - 1) // m) * m


def h_swish(
    x: jax.Array,
    *,
    target_block_bytes: int = 8 * 1024 * 1024,
    max_lane_width: int = 1024,
    min_pallas_bytes: int = 1 << 20,
) -> jax.Array:
    """Elementwise h_swish: x * ReLU6(x+3)/6. Works on any shape/dtype."""
    orig_shape = x.shape
    orig_dtype = x.dtype
    n = x.size
    if n == 0:
        return x
    itemsize = jnp.dtype(orig_dtype).itemsize

    # Tiny tensors: fixed pallas_call/DMA setup dominates; fused XLA is optimal.
    if n * itemsize < min_pallas_bytes:
        return _h_swish_jnp(x)

    # Widest lane width (multiple of 128) that divides n exactly: pure metadata
    # reshape, no pad and no post-slice (no extra HBM round trips).
    lw = None
    for cand in (max_lane_width, 512, 256, 128):
        if cand <= max_lane_width and n % cand == 0:
            lw = cand
            break
    if lw is None:
        # Not a multiple of 128: stitching a ragged tail back in the wrapper
        # would cost an extra full-array HBM round trip, so let XLA's single
        # fused elementwise pass handle it (already bandwidth-optimal).
        return _h_swish_jnp(x)

    rows = n // lw
    x2d = x.reshape(rows, lw)

    # Sublane packing granularity for this dtype (8 f32 / 16 bf16 / 32 int8).
    sublane = max(8, 32 // itemsize)

    # Constant bytes-per-grid-step (~8 MiB) across dtypes.
    max_br = max(sublane, (target_block_bytes // (lw * itemsize)) // sublane * sublane)

    # Megacore load balance: keep >= ~4 roughly equal grid steps when possible
    # so the "parallel" axis splits evenly across v7x's two TensorCores.
    balanced_br = _round_up(pl.cdiv(rows, 4), sublane)
    br = min(max_br, balanced_br, _round_up(rows, sublane))
    grid = (pl.cdiv(rows, br),)

    out2d = pl.pallas_call(
        _h_swish_kernel,
        out_shape=jax.ShapeDtypeStruct((rows, lw), orig_dtype),
        grid_spec=pltpu.PrefetchScalarGridSpec(
            num_scalar_prefetch=0,
            grid=grid,
            in_specs=[pl.BlockSpec((br, lw), lambda i: (i, 0))],
            out_specs=pl.BlockSpec((br, lw), lambda i: (i, 0)),
        ),
        compiler_params=pltpu.CompilerParams(
            dimension_semantics=("parallel",),
            # 8 MiB tiles, in + out double-buffered = 32 MiB, plus headroom;
            # under v7x's 64 MiB physical VMEM, trivial on v5e/v6e (128 MiB).
            vmem_limit_bytes=48 * 1024 * 1024,
        ),
    )(x2d)

    return out2d.reshape(orig_shape)


def h_swish_ref(x):
    return x * (jnp.clip(x + 3.0, 0.0, 6.0) / 6.0)


if __name__ == "__main__":
    key = jax.random.PRNGKey(0)
    # NCHW input consistent with the PyTorch module usage.
    x = jax.random.normal(key, (2, 4, 16, 16), dtype=jnp.float32) * 4.0
    ref = h_swish_ref(x)

    # Force the Pallas path at this small size (exercises masked partial-block
    # DMA: rows=2 < block rows=8).  Default wrapper would short-circuit.
    out = jax.block_until_ready(h_swish(x, min_pallas_bytes=0))
    assert out.shape == x.shape and out.dtype == x.dtype
    assert jnp.allclose(out, ref, atol=1e-6, rtol=1e-6)

    # Default wrapper (tiny input -> fused jnp short-circuit) must also match.
    out_small = jax.block_until_ready(h_swish(x))
    assert jnp.allclose(out_small, ref, atol=1e-6, rtol=1e-6)

    # Medium input exercising a multi-step, megacore-balanced grid (1 MiB).
    x_big = jax.random.normal(jax.random.PRNGKey(1), (8, 32, 32, 32), dtype=jnp.float32)
    out_big = jax.block_until_ready(h_swish(x_big))
    assert jnp.allclose(out_big, h_swish_ref(x_big), atol=1e-6, rtol=1e-6)

    # Non-128-divisible size: fused-jnp fallback (no pad/slice round trips).
    x_odd = jax.random.normal(jax.random.PRNGKey(2), (1000,), dtype=jnp.float32)
    out_odd = jax.block_until_ready(h_swish(x_odd))
    assert jnp.allclose(out_odd, h_swish_ref(x_odd), atol=1e-6, rtol=1e-6)

    print("KERNEL_OK")
</pallas_src>

<mosaic_0001>
module attributes {stable_mosaic.version = 11 : i64} {
  func.func @_h_swish_kernel(%arg0: i32, %arg1: memref<8x1024xf32, #tpu.memory_space<vmem>>, %arg2: memref<8x1024xf32, #tpu.memory_space<vmem>>) attributes {dimension_semantics = [#tpu.dimension_semantics<parallel>], iteration_bounds = array<i64: 1>, scalar_prefetch = 0 : i64, scratch_operands = 0 : i64, tpu.core_type = #tpu.core_type<tc>, window_params = [{transform_indices = @transform_0, window_bounds = array<i64: 8, 1024>}, {transform_indices = @transform_1, window_bounds = array<i64: 8, 1024>}]} {
    %c0 = arith.constant 0 : index
    %c0_0 = arith.constant 0 : index
    %0 = vector.load %arg1[%c0, %c0_0] : memref<8x1024xf32, #tpu.memory_space<vmem>>, vector<8x1024xf32>
    %cst = arith.constant 3.000000e+00 : f32
    %1 = vector.broadcast %cst : f32 to vector<8x1024xf32>
    %2 = arith.addf %0, %1 : vector<8x1024xf32>
    %cst_1 = arith.constant 0.000000e+00 : f32
    %cst_2 = arith.constant 6.000000e+00 : f32
    %3 = vector.broadcast %cst_1 : f32 to vector<8x1024xf32>
    %4 = arith.maximumf %3, %2 : vector<8x1024xf32>
    %5 = vector.broadcast %cst_2 : f32 to vector<8x1024xf32>
    %6 = arith.minimumf %5, %4 : vector<8x1024xf32>
    %cst_3 = arith.constant 6.000000e+00 : f32
    %7 = vector.broadcast %cst_3 : f32 to vector<8x1024xf32>
    %8 = arith.divf %6, %7 : vector<8x1024xf32>
    %9 = arith.mulf %0, %8 : vector<8x1024xf32>
    %c0_4 = arith.constant 0 : index
    %c0_5 = arith.constant 0 : index
    %10 = vector.load %arg2[%c0_4, %c0_5] : memref<8x1024xf32, #tpu.memory_space<vmem>>, vector<8x1024xf32>
    tpu.vector_store %arg2[%c0_4, %c0_5], %9 {strides = array<i32>} : memref<8x1024xf32, #tpu.memory_space<vmem>>, vector<8x1024xf32>,
    return
  }
  func.func @transform_0(%arg0: i32) -> (i32, i32) {
    %c0_i32 = arith.constant 0 : i32
    %c0_i32_0 = arith.constant 0 : i32
    return %arg0, %c0_i32 : i32, i32
  }
  func.func @transform_1(%arg0: i32) -> (i32, i32) {
    %c0_i32 = arith.constant 0 : i32
    %c0_i32_0 = arith.constant 0 : i32
    return %arg0, %c0_i32 : i32, i32
  }
}

</mosaic_0001>

<bundles_post_ra>
// kernel: tpu_custom_call.1
= control target key start
LH: loop header
LB: loop body
LE: loop exit
PB: predicated region body
PF: predicated region fallthrough
CT: control target
= control target key end

     0   :  { %6 = vsyncpa [#allocation3], 0  ;;  %s193_s0 = inlined_call_operand.hbm [shape: f32[2,1024], index: 0, kind: input, shape index: {}]   ;;  %s194_s1 = inlined_call_operand.hbm [shape: f32[2,1024], index: 1, kind: output, shape index: {}]  }
   0x1   :  { %7 = vsyncpa [#allocation4], 0 }
   0x2   :  { %12 = vsyncadd [#allocation3], 768  ;;  %s149_s6 = smov [#allocation2]   ;;  %s101_s10 = scalar_lea.hbm %s193_s0, 256 }
   0x3   :  { %s13_s7 = sshll.u32 %s149_s6, 4  ;;  %p102_p0 = scmp.ne.s32.totalorder %s193_s0, %s101_s10  ;;  %s14_s7 = int_to_ptr.vmem [resolvable:$true] %s13_s7 }
   0x4   :  { %p105_p1 = scmp.lt.u32.totalorder %s101_s10, %s193_s0 }
   0x6   :  { %p107_p2 = pnand %p105_p1, %p102_p0 }
   0x8   :  { %110 = shalt.err (!%p107_p2)
}
   0x9   :  { %s111_s15 = scalar_lea.vmem %s14_s7, 256  ;;  %s115_s16 = scalar_lea.vmem %s14_s7, 1024 }
   0xa   :  { %p112_p3 = scmp.ne.s32.totalorder %s14_s7, %s111_s15  ;;  %p116_p4 = scmp.lt.s32.totalorder %s14_s7, %s14_s7 }
   0xb   :  { %p117_p5 = scmp.lt.s32.totalorder %s115_s16, %s111_s15 }
   0xd   :  { %p118_p6 = por %p117_p5, %p116_p4 }
   0xf   :  { %p119_p7 = pnand %p118_p6, %p112_p3 }
  0x11   :  { %122 = shalt.err (!%p119_p7)
}
  0x12   :  { %s150_s17 = smov 256   ;;  %s151_s18 = smov 16  }
  0x13   :  { %19 = dma.hbm_to_vmem [thread:$0]  %s193_s0, 256, %s14_s7, [#allocation3], %s150_s17, %s150_s17, %s151_s18  }
  0x14   :  { %145 = dma.done.wait [#allocation3], 1024  }
  0x15   :  { %146 = vsyncadd [#allocation3], 4294966272  ;;  %v23_v0 = vld [vmem:[#allocation2] sm:$0xff]  ;;  %v24_v1 = vld [vmem:[#allocation2 + $0x8] sm:$0xff] }
  0x16   :  { %v25_v2 = vld [vmem:[#allocation2 + $0x10] sm:$0xff]  ;;  %v31_v3 = vadd.f32 3.0, %v23_v0  ;;  %v32_v4 = vadd.f32 3.0, %v24_v1  ;;  %v26_v6 = vld [vmem:[#allocation2 + $0x18] sm:$0xff]  ;;  %v27_v7 = vld [vmem:[#allocation2 + $0x20] sm:$0xff] }
  0x17   :  { %v33_v5 = vadd.f32 3.0, %v25_v2  ;;  %v28_v8 = vld [vmem:[#allocation2 + $0x28] sm:$0xff]  ;;  %v34_v9 = vadd.f32 3.0, %v26_v6  ;;  %v35_v10 = vadd.f32 3.0, %v27_v7  ;;  %v29_v12 = vld [vmem:[#allocation2 + $0x30] sm:$0xff]  ;;  %v30_v13 = vld [vmem:[#allocation2 + $0x38] sm:$0xff] }
  0x18   :  { %v36_v11 = vadd.f32 3.0, %v28_v8  ;;  %v39_v14 = vmax.f32 %v31_v3, 0.0  ;;  %v40_v15 = vmax.f32 %v32_v4, 0.0  ;;  %v37_v17 = vadd.f32 3.0, %v29_v12 }
  0x19   :  { %v41_v16 = vmax.f32 %v33_v5, 0.0  ;;  %v42_v18 = vmax.f32 %v34_v9, 0.0  ;;  %v43_v19 = vmax.f32 %v35_v10, 0.0  ;;  %v38_v21 = vadd.f32 3.0, %v30_v13 }
  0x1a   :  { %v44_v20 = vmax.f32 %v36_v11, 0.0  ;;  %v47_v22 = vmin.f32 %v39_v14, 6.0  ;;  %v48_v23 = vmin.f32 %v40_v15, 6.0  ;;  %v45_v25 = vmax.f32 %v37_v17, 0.0 }
  0x1b   :  { %v49_v24 = vmin.f32 %v41_v16, 6.0  ;;  %v50_v26 = vmin.f32 %v42_v18, 6.0  ;;  %v51_v27 = vmin.f32 %v43_v19, 6.0  ;;  %v46_v29 = vmax.f32 %v38_v21, 0.0 }
  0x1c   :  { %v52_v28 = vmin.f32 %v44_v20, 6.0  ;;  %v56_v30 = vmul.f32 0.16666667, %v47_v22  ;;  %v57_v31 = vmul.f32 0.16666667, %v48_v23  ;;  %v53_v39 = vmin.f32 %v45_v25, 6.0 }
  0x1d   :  { %v58_v32 = vmul.f32 0.16666667, %v49_v24  ;;  %v59_v33 = vmul.f32 0.16666667, %v50_v26  ;;  %v60_v34 = vmul.f32 0.16666667, %v51_v27 }
  0x1e   :  { %v61_v35 = vmul.f32 0.16666667, %v52_v28  ;;  %v64_v36 = vmul.f32 %v56_v30, %v23_v0  ;;  %v65_v37 = vmul.f32 %v57_v31, %v24_v1  ;;  %v54_v43 = vmin.f32 %v46_v29, 6.0 }
  0x1f   :  { %v66_v38 = vmul.f32 %v58_v32, %v25_v2  ;;  %v67_v40 = vmul.f32 %v59_v33, %v26_v6  ;;  %v68_v41 = vmul.f32 %v60_v34, %v27_v7  ;;  %v62_v44 = vmul.f32 0.16666667, %v53_v39 }
  0x20   :  { %v69_v42 = vmul.f32 %v61_v35, %v28_v8  ;;  %72 = vst [vmem:[#allocation5] sm:$0xff] %v64_v36  ;;  %73 = vst [vmem:[#allocation5 + $0x8] sm:$0xff] %v65_v37  ;;  %v63_v45 = vmul.f32 0.16666667, %v54_v43 }
  0x21   :  { %74 = vst [vmem:[#allocation5 + $0x10] sm:$0xff] %v66_v38  ;;  %75 = vst [vmem:[#allocation5 + $0x18] sm:$0xff] %v67_v40  ;;  %v70_v46 = vmul.f32 %v62_v44, %v29_v12 }
  0x22   :  { %76 = vst [vmem:[#allocation5 + $0x20] sm:$0xff] %v68_v41  ;;  %77 = vst [vmem:[#allocation5 + $0x28] sm:$0xff] %v69_v42  ;;  %v71_v47 = vmul.f32 %v63_v45, %v30_v13 }
  0x23   :  { %78 = vst [vmem:[#allocation5 + $0x30] sm:$0xff] %v70_v46 }
  0x24   :  { %79 = vst [vmem:[#allocation5 + $0x38] sm:$0xff] %v71_v47 }
  0x25   :  { %84 = vsyncadd [#allocation4], 768  ;;  %s152_s0 = smov [#allocation5]  }
  0x26   :  { %s85_s21 = sshll.u32 %s152_s0, 4  ;;  %s86_s21 = int_to_ptr.vmem [resolvable:$true] %s85_s21 }
  0x27   :  { %s123_s22 = scalar_lea.vmem %s86_s21, 256  ;;  %s127_s23 = scalar_lea.vmem %s86_s21, 1024 }
  0x28   :  { %p124_p8 = scmp.ne.s32.totalorder %s86_s21, %s123_s22  ;;  %p128_p9 = scmp.lt.s32.totalorder %s86_s21, %s86_s21 }
  0x29   :  { %p129_p10 = scmp.lt.s32.totalorder %s127_s23, %s123_s22 }
  0x2b   :  { %p130_p11 = por %p129_p10, %p128_p9 }
  0x2d   :  { %p131_p12 = pnand %p130_p11, %p124_p8 }
  0x2f   :  { %134 = shalt.err (!%p131_p12)
}
  0x30   :  { %s135_s26 = scalar_lea.hbm %s194_s1, 256 }
  0x31   :  { %p136_p13 = scmp.ne.s32.totalorder %s194_s1, %s135_s26  ;;  %p139_p0 = scmp.lt.u32.totalorder %s135_s26, %s194_s1 }
  0x33   :  { %p141_p1 = pnand %p139_p0, %p136_p13 }
  0x35   :  { %144 = shalt.err (!%p141_p1)
}
  0x36   :  { %91 = dma.vmem_to_hbm [thread:$0]  %s86_s21, 256, %s194_s1, [#allocation4], %s150_s17, %s150_s17, %s151_s18  }
  0x37   :  { %147 = dma.done.wait [#allocation4], 1024  }
  0x38   :  { %148 = vsyncadd [#allocation4], 4294966272 }
  0x39   :  { %95 = vsyncpa [#allocation3], 1 }
  0x3a   :  { %96 = vsyncpa [#allocation4], 1 }

</bundles_post_ra>
